<compile_context>
chip_gen: v7x
topology: tpu7x:2x2x1
jax: 0.10.0
libtpu: 0.0.40
codegen_flags: <defaults>
</compile_context>

<pallas_src>
import functools

import jax
import jax.numpy as jnp
from jax.experimental import pallas as pl
from jax.experimental.pallas import tpu as pltpu


# MXU-input dtype.  Set to jnp.bfloat16 on v6e/v7x for larger graphs
# (halves DMA bytes / VMEM, full-rate MXU); accumulation stays float32.
INPUT_DTYPE = jnp.float32


# ----------------------------- Pallas kernel ------------------------------ #

def _chebnet_fused_kernel(t_ref, x_ref, w1_ref, b1_ref, w2_ref, b2_ref, o_ref):
    """One batch per grid step; both ChebConv layers + ReLU fused.

    t_ref : [N, K*N]  horizontally stacked Chebyshev operators [T_0 | ... | T_{K-1}]
    x_ref : [N, C]    input features for this batch (batch dim squeezed)
    w1_ref: [K, C, H] layer-1 weights (per Chebyshev order)
    b1_ref: [1, H]
    w2_ref: [K, H, D] layer-2 weights
    b2_ref: [1, D]
    o_ref : [N, D]    output for this batch
    """
    K = w1_ref.shape[0]
    cdt = t_ref.dtype            # MXU-input dtype; accumulation is f32 throughout
    t = t_ref[...]               # [N, K*N]
    x = x_ref[...]               # [N, C]

    # ---- layer 1:  h1 = relu( sum_k T_k X W1_k + b1 ) -------------------- #
    # vstack_k(X @ W1_k): K tiny matmuls, stacked along the sublane (row) axis.
    z1 = jnp.concatenate(
        [jnp.dot(x, w1_ref[k], preferred_element_type=jnp.float32)
         for k in range(K)],
        axis=0).astype(cdt)                                          # [K*N, H]
    # single fat contraction over K*N
    h1 = jnp.maximum(
        jnp.dot(t, z1, preferred_element_type=jnp.float32) + b1_ref[...],
        0.0)                                                         # [N, H] f32

    # ---- layer 2:  h2 = relu( sum_k T_k h1 W2_k + b2 ) -------------------- #
    h1c = h1.astype(cdt)
    z2 = jnp.concatenate(
        [jnp.dot(h1c, w2_ref[k], preferred_element_type=jnp.float32)
         for k in range(K)],
        axis=0).astype(cdt)                                          # [K*N, D]
    h2 = jnp.maximum(
        jnp.dot(t, z2, preferred_element_type=jnp.float32) + b2_ref[...],
        0.0)                                                         # [N, D] f32

    o_ref[...] = h2.astype(o_ref.dtype)


def chebnet_fused(mul_l, x, w1, b1, w2, b2):
    """Fused 2-layer ChebNet forward.

    mul_l : [K, N, N] f32  precomputed Chebyshev polynomials T_k(L)
    x     : [B, N, C] f32
    w1    : [K, C, H] f32 ; b1: [1, H] f32
    w2    : [K, H, D] f32 ; b2: [1, D] f32
    returns [B, N, D] f32
    """
    K, N, _ = mul_l.shape
    B, _, C = x.shape
    H = w1.shape[-1]
    D = w2.shape[-1]

    # Static-graph preprocessing (plain JAX): stack the K operators side by side
    # so the in-kernel reduction over k becomes one [N, K*N] @ [K*N, *] matmul.
    t_cat = jnp.transpose(mul_l, (1, 0, 2)).reshape(N, K * N)

    t_cat = t_cat.astype(INPUT_DTYPE)
    x_in = x.astype(INPUT_DTYPE)
    w1_in = w1.astype(INPUT_DTYPE)
    w2_in = w2.astype(INPUT_DTYPE)

    return pl.pallas_call(
        _chebnet_fused_kernel,
        out_shape=jax.ShapeDtypeStruct((B, N, D), x.dtype),
        grid_spec=pltpu.PrefetchScalarGridSpec(
            num_scalar_prefetch=0,
            grid=(B,),  # one batch per step; parallel over TensorCores on v7x
            in_specs=[
                pl.BlockSpec((N, K * N), lambda b: (0, 0)),        # [T_0|..|T_{K-1}]
                pl.BlockSpec((None, N, C), lambda b: (b, 0, 0)),   # X_b
                pl.BlockSpec((K, C, H), lambda b: (0, 0, 0)),      # W1
                pl.BlockSpec((1, H), lambda b: (0, 0)),            # b1
                pl.BlockSpec((K, H, D), lambda b: (0, 0, 0)),      # W2
                pl.BlockSpec((1, D), lambda b: (0, 0)),            # b2
            ],
            out_specs=pl.BlockSpec((None, N, D), lambda b: (b, 0, 0)),
        ),
        compiler_params=pltpu.CompilerParams(
            dimension_semantics=("parallel",)),
    )(t_cat, x_in, w1_in, b1, w2_in, b2)


# ------------------------------ JAX glue ---------------------------------- #

def get_laplacian(graph, normalize=True):
    """graph: [N, N] adjacency (no self loops)."""
    if normalize:
        deg = jnp.sum(graph, axis=-1)
        # guard isolated nodes (deg == 0) against inf / NaN
        d_inv_sqrt = jnp.where(deg > 0, jax.lax.rsqrt(jnp.maximum(deg, 1e-12)), 0.0)
        dmat = jnp.diag(d_inv_sqrt)
        return jnp.eye(graph.shape[0], dtype=graph.dtype) - dmat @ graph @ dmat
    return jnp.diag(jnp.sum(graph, axis=-1)) - graph


def cheb_polynomial(laplacian, k_orders):
    """Return [k_orders, N, N]: T_0=I, T_1=L, T_k = 2 L T_{k-1} - T_{k-2}."""
    n = laplacian.shape[0]
    lap = laplacian.astype(jnp.float32)
    polys = [jnp.eye(n, dtype=jnp.float32)]
    if k_orders > 1:
        polys.append(lap)
    for _ in range(2, k_orders):
        polys.append(2.0 * (lap @ polys[-1]) - polys[-2])
    return jnp.stack(polys, axis=0)


def init_cheb_conv_params(key, in_c, out_c, K):
    """Mirror torch ChebConv: weight [K+1, 1, in_c, out_c] (xavier_normal),
    bias [1, 1, out_c] (zeros). Singleton dims dropped for the kernel."""
    fan_in = 1 * in_c * out_c
    fan_out = (K + 1) * in_c * out_c
    std = (2.0 / (fan_in + fan_out)) ** 0.5
    w = std * jax.random.normal(key, (K + 1, in_c, out_c), dtype=jnp.float32)
    b = jnp.zeros((1, out_c), dtype=jnp.float32)
    return w, b


def init_chebnet_params(key, in_c, hid_c, out_c, K):
    k1, k2 = jax.random.split(key)
    w1, b1 = init_cheb_conv_params(k1, in_c, hid_c, K)
    w2, b2 = init_cheb_conv_params(k2, hid_c, out_c, K)
    return {"w1": w1, "b1": b1, "w2": w2, "b2": b2}


@jax.jit
def chebnet_forward(flow_x, graph, params):
    """flow_x: [B, N, T, C_in]  -> output [B, N, 1, out_c]  (matches torch)."""
    B, N = flow_x.shape[0], flow_x.shape[1]
    x = flow_x.reshape(B, N, -1)                       # [B, N, T*C_in]

    lap = get_laplacian(graph.astype(jnp.float32), normalize=True)
    k_orders = params["w1"].shape[0]                   # K + 1
    mul_l = cheb_polynomial(lap, k_orders)             # [K+1, N, N]

    out = chebnet_fused(mul_l, x,
                        params["w1"], params["b1"],
                        params["w2"], params["b2"])    # [B, N, out_c]
    return out[:, :, None, :]                          # unsqueeze(2)


# --------------------------------- main ------------------------------------ #

if __name__ == "__main__":
    B, N, T, C_in = 2, 16, 4, 1       # flow_x: [B, N, T, C_in] -> in_c = T*C_in
    in_c, hid_c, out_c, K = T * C_in, 32, 8, 3

    key = jax.random.PRNGKey(0)
    k_graph, k_flow, k_params = jax.random.split(key, 3)

    # symmetric non-negative adjacency, no self-loops
    a = jax.random.uniform(k_graph, (N, N), dtype=jnp.float32)
    graph = (a + a.T) * 0.5
    graph = graph * (1.0 - jnp.eye(N, dtype=jnp.float32))

    flow_x = jax.random.normal(k_flow, (B, N, T, C_in), dtype=jnp.float32)

    params = init_chebnet_params(k_params, in_c, hid_c, out_c, K)

    out = chebnet_forward(flow_x, graph, params)
    out = jax.block_until_ready(out)
    assert out.shape == (B, N, 1, out_c), out.shape

    # sanity check against a pure-JAX reference of the same math
    def ref_conv(mul_l, x, w, b):
        r = jnp.einsum("knm,bmc->kbnc", mul_l, x)
        r = jnp.einsum("kbnc,kcd->kbnd", r, w)
        return jnp.maximum(jnp.sum(r, axis=0) + b[None], 0.0)

    lap = get_laplacian(graph, True)
    mul_l = cheb_polynomial(lap, K + 1)
    x0 = flow_x.reshape(B, N, -1)
    r1 = ref_conv(mul_l, x0, params["w1"], params["b1"])
    r2 = ref_conv(mul_l, r1, params["w2"], params["b2"])[:, :, None, :]
    assert jnp.allclose(out, r2, atol=1e-4, rtol=1e-4)

    print("KERNEL_OK")
</pallas_src>

<mosaic_0001>
module attributes {stable_mosaic.version = 11 : i64} {
  func.func @_chebnet_fused_kernel(%arg0: i32, %arg1: memref<16x64xf32, #tpu.memory_space<vmem>>, %arg2: memref<1x16x4xf32, #tpu.memory_space<vmem>>, %arg3: memref<4x4x32xf32, #tpu.memory_space<vmem>>, %arg4: memref<1x32xf32, #tpu.memory_space<vmem>>, %arg5: memref<4x32x8xf32, #tpu.memory_space<vmem>>, %arg6: memref<1x8xf32, #tpu.memory_space<vmem>>, %arg7: memref<1x16x8xf32, #tpu.memory_space<vmem>>) attributes {dimension_semantics = [#tpu.dimension_semantics<parallel>], iteration_bounds = array<i64: 2>, scalar_prefetch = 0 : i64, scratch_operands = 0 : i64, tpu.core_type = #tpu.core_type<tc>, window_params = [{pipeline_mode = #tpu.pipeline_mode<synchronous>, transform_indices = @transform_0, window_bounds = array<i64: 16, 64>}, {transform_indices = @transform_1, window_bounds = array<i64: 1, 16, 4>}, {pipeline_mode = #tpu.pipeline_mode<synchronous>, transform_indices = @transform_2, window_bounds = array<i64: 4, 4, 32>}, {pipeline_mode = #tpu.pipeline_mode<synchronous>, transform_indices = @transform_3, window_bounds = array<i64: 1, 32>}, {pipeline_mode = #tpu.pipeline_mode<synchronous>, transform_indices = @transform_4, window_bounds = array<i64: 4, 32, 8>}, {pipeline_mode = #tpu.pipeline_mode<synchronous>, transform_indices = @transform_5, window_bounds = array<i64: 1, 8>}, {transform_indices = @transform_6, window_bounds = array<i64: 1, 16, 8>}]} {
    %c0 = arith.constant 0 : index
    %c0_0 = arith.constant 0 : index
    %0 = vector.load %arg1[%c0, %c0_0] : memref<16x64xf32, #tpu.memory_space<vmem>>, vector<16x64xf32>
    %c0_1 = arith.constant 0 : index
    %c0_2 = arith.constant 0 : index
    %c0_3 = arith.constant 0 : index
    %1 = vector.load %arg2[%c0_1, %c0_2, %c0_3] : memref<1x16x4xf32, #tpu.memory_space<vmem>>, vector<1x16x4xf32>
    %2 = vector.shape_cast %1 : vector<1x16x4xf32> to vector<16x4xf32>
    %c0_4 = arith.constant 0 : index
    %c0_5 = arith.constant 0 : index
    %c0_6 = arith.constant 0 : index
    %3 = vector.load %arg3[%c0_4, %c0_5, %c0_6] : memref<4x4x32xf32, #tpu.memory_space<vmem>>, vector<1x4x32xf32>
    %4 = vector.shape_cast %3 : vector<1x4x32xf32> to vector<4x32xf32>
    %cst = arith.constant dense<0.000000e+00> : vector<16x32xf32>
    %5 = tpu.matmul %2, %4, %cst {dimension_numbers = #tpu.dot_dimension_numbers<[1], [0], [0], [1], [0, 0, 1, 1], [], []>} : vector<16x4xf32>, vector<4x32xf32>, vector<16x32xf32> -> vector<16x32xf32>
    %c1 = arith.constant 1 : index
    %c0_7 = arith.constant 0 : index
    %c0_8 = arith.constant 0 : index
    %6 = vector.load %arg3[%c1, %c0_7, %c0_8] : memref<4x4x32xf32, #tpu.memory_space<vmem>>, vector<1x4x32xf32>
    %7 = vector.shape_cast %6 : vector<1x4x32xf32> to vector<4x32xf32>
    %cst_9 = arith.constant dense<0.000000e+00> : vector<16x32xf32>
    %8 = tpu.matmul %2, %7, %cst_9 {dimension_numbers = #tpu.dot_dimension_numbers<[1], [0], [0], [1], [0, 0, 1, 1], [], []>} : vector<16x4xf32>, vector<4x32xf32>, vector<16x32xf32> -> vector<16x32xf32>
    %c2 = arith.constant 2 : index
    %c0_10 = arith.constant 0 : index
    %c0_11 = arith.constant 0 : index
    %9 = vector.load %arg3[%c2, %c0_10, %c0_11] : memref<4x4x32xf32, #tpu.memory_space<vmem>>, vector<1x4x32xf32>
    %10 = vector.shape_cast %9 : vector<1x4x32xf32> to vector<4x32xf32>
    %cst_12 = arith.constant dense<0.000000e+00> : vector<16x32xf32>
    %11 = tpu.matmul %2, %10, %cst_12 {dimension_numbers = #tpu.dot_dimension_numbers<[1], [0], [0], [1], [0, 0, 1, 1], [], []>} : vector<16x4xf32>, vector<4x32xf32>, vector<16x32xf32> -> vector<16x32xf32>
    %c3 = arith.constant 3 : index
    %c0_13 = arith.constant 0 : index
    %c0_14 = arith.constant 0 : index
    %12 = vector.load %arg3[%c3, %c0_13, %c0_14] : memref<4x4x32xf32, #tpu.memory_space<vmem>>, vector<1x4x32xf32>
    %13 = vector.shape_cast %12 : vector<1x4x32xf32> to vector<4x32xf32>
    %cst_15 = arith.constant dense<0.000000e+00> : vector<16x32xf32>
    %14 = tpu.matmul %2, %13, %cst_15 {dimension_numbers = #tpu.dot_dimension_numbers<[1], [0], [0], [1], [0, 0, 1, 1], [], []>} : vector<16x4xf32>, vector<4x32xf32>, vector<16x32xf32> -> vector<16x32xf32>
    %15 = tpu.concatenate %5, %8, %11, %14 in 0 : vector<16x32xf32>, vector<16x32xf32>, vector<16x32xf32>, vector<16x32xf32> -> vector<64x32xf32>
    %cst_16 = arith.constant dense<0.000000e+00> : vector<16x32xf32>
    %16 = tpu.matmul %0, %15, %cst_16 {dimension_numbers = #tpu.dot_dimension_numbers<[1], [0], [0], [1], [0, 0, 1, 1], [], []>} : vector<16x64xf32>, vector<64x32xf32>, vector<16x32xf32> -> vector<16x32xf32>
    %c0_17 = arith.constant 0 : index
    %c0_18 = arith.constant 0 : index
    %17 = vector.load %arg4[%c0_17, %c0_18] : memref<1x32xf32, #tpu.memory_space<vmem>>, vector<1x32xf32>
    %18 = vector.broadcast %17 : vector<1x32xf32> to vector<16x32xf32>
    %19 = arith.addf %16, %18 : vector<16x32xf32>
    %cst_19 = arith.constant 0.000000e+00 : f32
    %20 = vector.broadcast %cst_19 : f32 to vector<16x32xf32>
    %21 = arith.maximumf %19, %20 : vector<16x32xf32>
    %c0_20 = arith.constant 0 : index
    %c0_21 = arith.constant 0 : index
    %c0_22 = arith.constant 0 : index
    %22 = vector.load %arg5[%c0_20, %c0_21, %c0_22] : memref<4x32x8xf32, #tpu.memory_space<vmem>>, vector<1x32x8xf32>
    %23 = vector.shape_cast %22 : vector<1x32x8xf32> to vector<32x8xf32>
    %cst_23 = arith.constant dense<0.000000e+00> : vector<16x8xf32>
    %24 = tpu.matmul %21, %23, %cst_23 {dimension_numbers = #tpu.dot_dimension_numbers<[1], [0], [0], [1], [0, 0, 1, 1], [], []>} : vector<16x32xf32>, vector<32x8xf32>, vector<16x8xf32> -> vector<16x8xf32>
    %c1_24 = arith.constant 1 : index
    %c0_25 = arith.constant 0 : index
    %c0_26 = arith.constant 0 : index
    %25 = vector.load %arg5[%c1_24, %c0_25, %c0_26] : memref<4x32x8xf32, #tpu.memory_space<vmem>>, vector<1x32x8xf32>
    %26 = vector.shape_cast %25 : vector<1x32x8xf32> to vector<32x8xf32>
    %cst_27 = arith.constant dense<0.000000e+00> : vector<16x8xf32>
    %27 = tpu.matmul %21, %26, %cst_27 {dimension_numbers = #tpu.dot_dimension_numbers<[1], [0], [0], [1], [0, 0, 1, 1], [], []>} : vector<16x32xf32>, vector<32x8xf32>, vector<16x8xf32> -> vector<16x8xf32>
    %c2_28 = arith.constant 2 : index
    %c0_29 = arith.constant 0 : index
    %c0_30 = arith.constant 0 : index
    %28 = vector.load %arg5[%c2_28, %c0_29, %c0_30] : memref<4x32x8xf32, #tpu.memory_space<vmem>>, vector<1x32x8xf32>
    %29 = vector.shape_cast %28 : vector<1x32x8xf32> to vector<32x8xf32>
    %cst_31 = arith.constant dense<0.000000e+00> : vector<16x8xf32>
    %30 = tpu.matmul %21, %29, %cst_31 {dimension_numbers = #tpu.dot_dimension_numbers<[1], [0], [0], [1], [0, 0, 1, 1], [], []>} : vector<16x32xf32>, vector<32x8xf32>, vector<16x8xf32> -> vector<16x8xf32>
    %c3_32 = arith.constant 3 : index
    %c0_33 = arith.constant 0 : index
    %c0_34 = arith.constant 0 : index
    %31 = vector.load %arg5[%c3_32, %c0_33, %c0_34] : memref<4x32x8xf32, #tpu.memory_space<vmem>>, vector<1x32x8xf32>
    %32 = vector.shape_cast %31 : vector<1x32x8xf32> to vector<32x8xf32>
    %cst_35 = arith.constant dense<0.000000e+00> : vector<16x8xf32>
    %33 = tpu.matmul %21, %32, %cst_35 {dimension_numbers = #tpu.dot_dimension_numbers<[1], [0], [0], [1], [0, 0, 1, 1], [], []>} : vector<16x32xf32>, vector<32x8xf32>, vector<16x8xf32> -> vector<16x8xf32>
    %34 = tpu.concatenate %24, %27, %30, %33 in 0 : vector<16x8xf32>, vector<16x8xf32>, vector<16x8xf32>, vector<16x8xf32> -> vector<64x8xf32>
    %cst_36 = arith.constant dense<0.000000e+00> : vector<16x8xf32>
    %35 = tpu.matmul %0, %34, %cst_36 {dimension_numbers = #tpu.dot_dimension_numbers<[1], [0], [0], [1], [0, 0, 1, 1], [], []>} : vector<16x64xf32>, vector<64x8xf32>, vector<16x8xf32> -> vector<16x8xf32>
    %c0_37 = arith.constant 0 : index
    %c0_38 = arith.constant 0 : index
    %36 = vector.load %arg6[%c0_37, %c0_38] : memref<1x8xf32, #tpu.memory_space<vmem>>, vector<1x8xf32>
    %37 = vector.broadcast %36 : vector<1x8xf32> to vector<16x8xf32>
    %38 = arith.addf %35, %37 : vector<16x8xf32>
    %cst_39 = arith.constant 0.000000e+00 : f32
    %39 = vector.broadcast %cst_39 : f32 to vector<16x8xf32>
    %40 = arith.maximumf %38, %39 : vector<16x8xf32>
    %c0_40 = arith.constant 0 : index
    %c0_41 = arith.constant 0 : index
    %c0_42 = arith.constant 0 : index
    %41 = vector.load %arg7[%c0_40, %c0_41, %c0_42] : memref<1x16x8xf32, #tpu.memory_space<vmem>>, vector<1x16x8xf32>
    %42 = vector.shape_cast %41 : vector<1x16x8xf32> to vector<16x8xf32>
    %43 = vector.shape_cast %40 : vector<16x8xf32> to vector<1x16x8xf32>
    tpu.vector_store %arg7[%c0_40, %c0_41, %c0_42], %43 {strides = array<i32>} : memref<1x16x8xf32, #tpu.memory_space<vmem>>, vector<1x16x8xf32>,
    return
  }
  func.func @transform_0(%arg0: i32) -> (i32, i32) {
    %c0_i32 = arith.constant 0 : i32
    %c0_i32_0 = arith.constant 0 : i32
    %c0_i32_1 = arith.constant 0 : i32
    return %c0_i32, %c0_i32_0 : i32, i32
  }
  func.func @transform_1(%arg0: i32) -> (i32, i32, i32) {
    %c0_i32 = arith.constant 0 : i32
    %c0_i32_0 = arith.constant 0 : i32
    %c0_i32_1 = arith.constant 0 : i32
    return %arg0, %c0_i32, %c0_i32_0 : i32, i32, i32
  }
  func.func @transform_2(%arg0: i32) -> (i32, i32, i32) {
    %c0_i32 = arith.constant 0 : i32
    %c0_i32_0 = arith.constant 0 : i32
    %c0_i32_1 = arith.constant 0 : i32
    %c0_i32_2 = arith.constant 0 : i32
    return %c0_i32, %c0_i32_0, %c0_i32_1 : i32, i32, i32
  }
  func.func @transform_3(%arg0: i32) -> (i32, i32) {
    %c0_i32 = arith.constant 0 : i32
    %c0_i32_0 = arith.constant 0 : i32
    %c0_i32_1 = arith.constant 0 : i32
    return %c0_i32, %c0_i32_0 : i32, i32
  }
  func.func @transform_4(%arg0: i32) -> (i32, i32, i32) {
    %c0_i32 = arith.constant 0 : i32
    %c0_i32_0 = arith.constant 0 : i32
    %c0_i32_1 = arith.constant 0 : i32
    %c0_i32_2 = arith.constant 0 : i32
    return %c0_i32, %c0_i32_0, %c0_i32_1 : i32, i32, i32
  }
  func.func @transform_5(%arg0: i32) -> (i32, i32) {
    %c0_i32 = arith.constant 0 : i32
    %c0_i32_0 = arith.constant 0 : i32
    %c0_i32_1 = arith.constant 0 : i32
    return %c0_i32, %c0_i32_0 : i32, i32
  }
  func.func @transform_6(%arg0: i32) -> (i32, i32, i32) {
    %c0_i32 = arith.constant 0 : i32
    %c0_i32_0 = arith.constant 0 : i32
    %c0_i32_1 = arith.constant 0 : i32
    return %arg0, %c0_i32, %c0_i32_0 : i32, i32, i32
  }
}

</mosaic_0001>

<bundles_post_ra>
// kernel: chebnet_forward.1
= control target key start
LH: loop header
LB: loop body
LE: loop exit
PB: predicated region body
PF: predicated region fallthrough
CT: control target
= control target key end

     0   :  { %s1469_s21 = smov 0   ;;  %s1589_s0 = inlined_call_operand.vmem [shape: f32[16,64], index: 0, kind: input, shape index: {}]   ;;  %s1590_s1 = inlined_call_operand.vmem [shape: f32[2,16,4], index: 1, kind: input, shape index: {}]   ;;  %s1591_s2 = inlined_call_operand.vmem [shape: f32[4,4,32], index: 2, kind: input, shape index: {}]   ;;  %s1592_s3 = inlined_call_operand.vmem [shape: f32[1,32], index: 3, kind: input, shape index: {}]   ;;  %s1593_s4 = inlined_call_operand.vmem [shape: f32[4,32,8], index: 4, kind: input, shape index: {}]   ;;  %s1594_s5 = inlined_call_operand.vmem [shape: f32[1,8], index: 5, kind: input, shape index: {}]   ;;  %s1595_s6 = inlined_call_operand.vmem [shape: f32[2,16,8], index: 6, kind: output, shape index: {}]  }
   0x1 LB: > { %s1142_s22 = sadd.s32 4294967295, %s1432_s21   ;;  %p1146_p0 = scmp.ge.s32.totalorder %s1432_s21, 1  ;;  %s1432_s21 = sphi %s1469_s21, %s16_s21  }
   0x2   : > { %p212_p1 = scmp.lt.s32.totalorder %s1432_s21, 3 }
   0x4   : > { %p213_p2 = pnand %p1146_p0, %p212_p1 }
   0x5   : > { %v256_v0 = vld [vmem:[%s1591_s2] sm:$0xf] (!%p213_p2)  ;;  %vm264_vm0 = vcmask (!%p213_p2), 1043456   ;;  %p242_p3 = scmp.lt.s32.totalorder (!%p213_p2), %s1142_s22, 1  ;;  %v1154_v1 = vld [vmem:[%s1591_s2 + $0x4] sm:$0xf] (!%p213_p2) }
   0x6   : > { %216 = sbr.rel (%p213_p2) target bundleno = 928 (0x3a0), region = 44  ;;  %1252 = vmatprep.subr.msk.mxu0 (!%p213_p2), %vm264_vm0, %v256_v0  ;;  %v1158_v2 = vld [vmem:[%s1591_s2 + $0x8] sm:$0xf] (!%p213_p2)  ;;  %v1162_v3 = vld [vmem:[%s1591_s2 + $0xc] sm:$0xf] (!%p213_p2)  ;;  %1257 = vmatprep.subr.msk.mxu1 (!%p213_p2), %vm264_vm0, %v1154_v1  ;;  %vm257_vm1 = vcmask (!%p213_p2), 31744  }
   0x7   : > { %1253 = vmatpush3.msk.msra.mxu0 (!%p213_p2), %vm264_vm0, %v256_v0  ;;  %1258 = vmatpush3.msk.msra.mxu1 (!%p213_p2), %vm264_vm0, %v1154_v1  ;;  %v252_v6 = vld [vmem:[%s1589_s0] sm:$0xff] (!%p213_p2)  ;;  %vm590_vm2 = vcmask (!%p213_p2), 523264   ;;  %v675_v8 = vld [vmem:[%s1593_s4 + $0x8] sm:$0xff] (!%p213_p2)  ;;  %v676_v23 = vld [vmem:[%s1593_s4 + $0x10] sm:$0xff] (!%p213_p2)  ;;  %vm678_vm3 = vcmask (!%p213_p2), 261120   ;;  %vm1084_vm4 = vcmask (!%p213_p2), 64512  }
   0x8   : > { %1262 = vmatprep.subr.msk.mxu0 (!%p213_p2), %vm264_vm0, %v1158_v2  ;;  %1267 = vmatprep.subr.msk.mxu1 (!%p213_p2), %vm264_vm0, %v1162_v3  ;;  %v674_v7 = vld [vmem:[%s1593_s4] sm:$0xff] (!%p213_p2)  ;;  %v1518_v22 = vld [vmem:[%s1589_s0 + $0x8] sm:$0xff] (!%p213_p2)  ;;  %v677_v24 = vld [vmem:[%s1593_s4 + $0x18] sm:$0xff] (!%p213_p2) }
   0x9   : > { %v1370_v9 = vpack.c.bf16 (!%p213_p2), %v675_v8, %v674_v7  ;;  %v1374_v25 = vpack.c.bf16 (!%p213_p2), %v677_v24, %v676_v23  ;;  %v1171_v26 = vld [vmem:[%s1593_s4 + $0x20] sm:$0xff] (!%p213_p2)  ;;  %v1172_v27 = vld [vmem:[%s1593_s4 + $0x28] sm:$0xff] (!%p213_p2)  ;;  %v1173_v34 = vld [vmem:[%s1593_s4 + $0x30] sm:$0xff] (!%p213_p2) }
   0xa   : > { %v1378_v28 = vpack.c.bf16 (!%p213_p2), %v1172_v27, %v1171_v26  ;;  %v1166_v29 = vld [vmem:[%s1592_s3] ss:$0 sm:$0xff] (!%p213_p2)  ;;  %v1174_v35 = vld [vmem:[%s1593_s4 + $0x38] sm:$0xff] (!%p213_p2)  ;;  %v1178_v40 = vld [vmem:[%s1593_s4 + $0x48] sm:$0xff] (!%p213_p2) }
   0xb   : > { %v1382_v38 = vpack.c.bf16 (!%p213_p2), %v1174_v35, %v1173_v34  ;;  %v1177_v39 = vld [vmem:[%s1593_s4 + $0x40] sm:$0xff] (!%p213_p2)  ;;  %v1179_v42 = vld [vmem:[%s1593_s4 + $0x50] sm:$0xff] (!%p213_p2)  ;;  %v1180_v43 = vld [vmem:[%s1593_s4 + $0x58] sm:$0xff] (!%p213_p2) }
   0xc   : > { %v1386_v41 = vpack.c.bf16 (!%p213_p2), %v1178_v40, %v1177_v39  ;;  %v1390_v44 = vpack.c.bf16 (!%p213_p2), %v1180_v43, %v1179_v42  ;;  %v1183_v45 = vld [vmem:[%s1593_s4 + $0x60] sm:$0xff] (!%p213_p2)  ;;  %v1184_v46 = vld [vmem:[%s1593_s4 + $0x68] sm:$0xff] (!%p213_p2)  ;;  %v1185_v48 = vld [vmem:[%s1593_s4 + $0x70] sm:$0xff] (!%p213_p2) }
   0xd   : > { %s1597_s22 = smov (!%p242_p3, %s1142_s22), 1  ;;  %v1394_v47 = vpack.c.bf16 %v1184_v46, %v1183_v45  ;;  %v1186_v49 = vld [vmem:[%s1593_s4 + $0x78] sm:$0xff]  ;;  %v1189_v63 = vld [vmem:[%s1594_s5] ss:$0 sm:$0xff] }
   0xe   : > { %s1194_s7 = sshll.u32 %s1597_s22, 4  ;;  %v1398_v50 = vpack.c.bf16 %v1186_v49, %v1185_v48 }
   0xf   : > { %s246_s10 = scalar_lea.vmem %s1590_s1, %s1194_s7  ;;  %s251_s11 = scalar_lea.vmem %s1595_s6, %s1194_s7 }
  0x10   : > { %v254_v4 = vld [vmem:[%s246_s10] sm:$0xff]  ;;  %v255_v5 = vld [vmem:[%s246_s10 + $0x8] sm:$0xff] }
  0x11   : > { %1254 = vmatprep.mubr.msk.f32.mxu0 %vm257_vm1, %v254_v4  ;;  %1259 = vmatprep.mubr.msk.f32.mxu1 %vm257_vm1, %v254_v4 }
  0x12   : > { %1255 = vmatmul.mubr.msk.f32.vlgmr.msra.gmra.mrb[0].mxu0 %vm257_vm1, %v255_v5  ;;  %1260 = vmatmul.mubr.msk.f32.vlgmr.msra.gmra.mrb[0].mxu1 %vm257_vm1, %v255_v5 }
  0x13   : > { %1263 = vmatpush3.msk.msra.mxu0 %vm264_vm0, %v1158_v2  ;;  %1264 = vmatprep.mubr.msk.f32.mxu0 %vm257_vm1, %v254_v4 }
  0x14   : > { %1268 = vmatpush3.msk.msra.mxu1 %vm264_vm0, %v1162_v3  ;;  %1269 = vmatprep.mubr.msk.f32.mxu1 %vm257_vm1, %v254_v4 }
  0x15   : > { %1371 = vmatprep.subr.bf16.mxu1 %v1370_v9 }
  0x16   : > { %1265 = vmatmul.mubr.msk.f32.vlgmr.msra.gmra.mrb[2].mxu0 %vm257_vm1, %v255_v5  ;;  %1270 = vmatmul.mubr.msk.f32.vlgmr.msra.gmra.mrb[2].mxu1 %vm257_vm1, %v255_v5 }
  0x17   : > { %1288 = vmatprep.mubr.msk.f32.mxu0 %vm590_vm2, %v252_v6  ;;  %1373 = vmatpush3.bf16.msra.mxu1 %v1370_v9 }
  0x18   : > { %1375 = vmatprep.subr.bf16.mxu1 %v1374_v25 }
  0x1b   : > { %1377 = vmatpush3.bf16.msra.mxu1 %v1374_v25 }
  0x1c   : > { %1379 = vmatprep.subr.bf16.mxu1 %v1378_v28 }
  0xe5   : > { %v1256_v10 = vpop.f32.mrb[0].mxu0  ;;  %v1261_v11 = vpop.f32.mrb[0].mxu1 }
  0xe6   : > { %v334_v12 = vpop.f32.mrb[1].mxu0  ;;  %v414_v13 = vpop.f32.mrb[1].mxu1 }
  0xe7   : > { %v1354_v14 = vpack.c.bf16 %v1256_v10, %v334_v12  ;;  %v1358_v15 = vpack.c.bf16 %v1261_v11, %v414_v13 }
  0xe9   : > { %1355 = vmatprep.subr.bf16.mxu0 %v1354_v14  ;;  %v1266_v16 = vpop.f32.mrb[2].mxu0  ;;  %v1271_v17 = vpop.f32.mrb[2].mxu1 }
  0xea   : > { %1357 = vmatpush3.bf16.msra.mxu0 %v1354_v14  ;;  %v494_v18 = vpop.f32.mrb[3].mxu0  ;;  %v574_v19 = vpop.f32.mrb[3].mxu1 }
  0xeb   : > { %1359 = vmatprep.subr.bf16.mxu0 %v1358_v15  ;;  %v1362_v20 = vpack.c.bf16 %v1266_v16, %v494_v18  ;;  %v1366_v21 = vpack.c.bf16 %v1271_v17, %v574_v19 }
  0xee   : > { %1361 = vmatpush3.bf16.msra.mxu0 %v1358_v15 }
  0xef   : > { %1363 = vmatprep.subr.bf16.mxu0 %v1362_v20 }
  0xf2   : > { %1365 = vmatpush3.bf16.msra.mxu0 %v1362_v20 }
  0xf3   : > { %1367 = vmatprep.subr.bf16.mxu0 %v1366_v21 }
  0xf6   : > { %1369 = vmatpush3.bf16.msra.mxu0 %v1366_v21 }
  0xf9   : > { %1289 = vmatmul.mubr.msk.f32.vlgmr.msra.gmra.mrb[4].mxu0 %vm590_vm2, %v1518_v22 }
  0xfa   : > { %1351 = vmatprep.mubr.msk.f32.mxu0 %vm590_vm2, %v252_v6 }
 0x1cc   : > { %v1290_v30 = vpop.f32.mrb[4].mxu0 }
 0x1cd   : > { %v669_v31 = vadd.f32 %v1290_v30, %v1166_v29  ;;  %v663_v32 = vpop.f32.mrb[5].mxu0 }
 0x1ce   : > { %v664_v33 = vadd.f32 %v1166_v29, %v663_v32 }
 0x1cf   : > { %v673_v37 = vmax.f32 %v669_v31, 0.0 }
 0x1d0   : > { %v672_v36 = vmax.f32 %v664_v33, 0.0 }
 0x1d2   : > { %1299 = vmatprep.mubr.msk.f32.mxu1 %vm678_vm3, %v672_v36 }
 0x1d3   : > { %1300 = vmatmul.mubr.msk.f32.vlgmr.msra.gmra.mrb[4].mxu1 %vm678_vm3, %v673_v37 }
 0x1d4   : > { %1381 = vmatpush3.bf16.msra.mxu1 %v1378_v28  ;;  %1310 = vmatprep.mubr.msk.f32.mxu1 %vm678_vm3, %v672_v36 }
 0x1d5   : > { %1383 = vmatprep.subr.bf16.mxu1 %v1382_v38 }
 0x1d8   : > { %1385 = vmatpush3.bf16.msra.mxu1 %v1382_v38 }
 0x1d9   : > { %1387 = vmatprep.subr.bf16.mxu1 %v1386_v41 }
 0x1db   : > { %1311 = vmatmul.mubr.msk.f32.vlgmr.msra.gmra.mrb[6].mxu1 %vm678_vm3, %v673_v37 }
 0x1dc   : > { %1389 = vmatpush3.bf16.msra.mxu1 %v1386_v41  ;;  %1321 = vmatprep.mubr.msk.f32.mxu1 %vm678_vm3, %v672_v36 }
 0x1dd   : > { %1391 = vmatprep.subr.bf16.mxu1 %v1390_v44 }
 0x1e0   : > { %1393 = vmatpush3.bf16.msra.mxu1 %v1390_v44 }
 0x1e1   : > { %1395 = vmatprep.subr.bf16.mxu1 %v1394_v47 }
 0x1e3   : > { %1322 = vmatmul.mubr.msk.f32.vlgmr.msra.gmra.mrb[8].mxu1 %vm678_vm3, %v673_v37 }
 0x1e4   : > { %1397 = vmatpush3.bf16.msra.mxu1 %v1394_v47  ;;  %1332 = vmatprep.mubr.msk.f32.mxu1 %vm678_vm3, %v672_v36 }
 0x1e5   : > { %1399 = vmatprep.subr.bf16.mxu1 %v1398_v50 }
 0x1e8   : > { %1401 = vmatpush3.bf16.msra.mxu1 %v1398_v50 }
 0x1eb   : > { %1333 = vmatmul.mubr.msk.f32.vlgmr.msra.gmra.mrb[10].mxu1 %vm678_vm3, %v673_v37 }
 0x2a6   : > { %v1301_v51 = vpop.f32.mrb[4].mxu1 }
 0x2a7   : > { %v751_v52 = vpop.f32.mrb[5].mxu1 }
 0x2a8   : > { %v1402_v53 = vpack.c.bf16 %v1301_v51, %v751_v52 }
 0x2aa   : > { %1403 = vmatprep.subr.bf16.mxu0 %v1402_v53 }
 0x2ab   : > { %1405 = vmatpush3.bf16.msra.mxu0 %v1402_v53 }
 0x2ae   : > { %v1312_v54 = vpop.f32.mrb[6].mxu1 }
 0x2af   : > { %v831_v55 = vpop.f32.mrb[7].mxu1 }
 0x2b0   : > { %v1406_v56 = vpack.c.bf16 %v1312_v54, %v831_v55 }
 0x2b2   : > { %1407 = vmatprep.subr.bf16.mxu0 %v1406_v56 }
 0x2b3   : > { %1409 = vmatpush3.bf16.msra.mxu0 %v1406_v56 }
 0x2b6   : > { %v1323_v57 = vpop.f32.mrb[8].mxu1 }
 0x2b7   : > { %v911_v58 = vpop.f32.mrb[9].mxu1 }
 0x2b8   : > { %v1410_v59 = vpack.c.bf16 %v1323_v57, %v911_v58 }
 0x2ba   : > { %1411 = vmatprep.subr.bf16.mxu0 %v1410_v59 }
 0x2bb   : > { %1413 = vmatpush3.bf16.msra.mxu0 %v1410_v59 }
 0x2be   : > { %v1334_v60 = vpop.f32.mrb[10].mxu1 }
 0x2bf   : > { %v991_v61 = vpop.f32.mrb[11].mxu1 }
 0x2c0   : > { %v1414_v62 = vpack.c.bf16 %v1334_v60, %v991_v61 }
 0x2c2   : > { %1415 = vmatprep.subr.bf16.mxu0 %v1414_v62 }
 0x2c3   : > { %1417 = vmatpush3.bf16.msra.mxu0 %v1414_v62 }
 0x2c6   : > { %1352 = vmatmul.mubr.msk.f32.vlgmr.msra.gmra.mrb[6].mxu0 %vm590_vm2, %v1518_v22 }
 0x399   : > { %v1353_v0 = vpop.f32.mrb[6].mxu0 }
 0x39a   : > { %v1079_v1 = vadd.f32 %v1353_v0, %v1189_v63  ;;  %v1073_v2 = vpop.f32.mrb[7].mxu0 }
 0x39b   : > { %v1074_v3 = vadd.f32 %v1189_v63, %v1073_v2 }
 0x39c   : > { %v1083_v4 = vmax.f32 %v1079_v1, 0.0 }
 0x39d   : > { %v1082_v5 = vmax.f32 %v1074_v3, 0.0 }
 0x39e   : > { %1086 = vst.msk [vmem:[%s251_s11 + $0x8] sm:$0xff] %vm1084_vm4, %v1083_v4 }
 0x39f   : > { %1085 = vst.msk [vmem:[%s251_s11] sm:$0xff] %vm1084_vm4, %v1082_v5 }
 0x3a0 PF: > { %s16_s21 = sadd.s32 1, %s1432_s21  }
 0x3a1   : > { %p13_p4 = scmp.ge.s32.totalorder %s16_s21, 4  }
 0x3a3   :  { %15 = sbr.rel (!%p13_p4) target bundleno = 1 (0x1), region = 80 }

</bundles_post_ra>
